<compile_context>
chip_gen: v7x
topology: tpu7x:2x2x1
jax: 0.10.0
libtpu: 0.0.40
codegen_flags: <defaults>
</compile_context>

<pallas_src>
import functools

import jax
import jax.numpy as jnp
from jax.experimental import pallas as pl
from jax.experimental.pallas import tpu as pltpu

_LANE = 128


def _sublane_for_dtype(dtype) -> int:
    """Rows-per-vreg for this dtype (8 for 4-byte, 16 for 2-byte, 32 for 1-byte)."""
    itemsize = jnp.dtype(dtype).itemsize
    return max(8, 32 // itemsize)


def _round_down(x: int, m: int) -> int:
    return (x // m) * m


def _round_up(x: int, m: int) -> int:
    return ((x + m - 1) // m) * m


# ----------------------------- kernel bodies ------------------------------- #

def _huber_math_f32(x, delta: float):
    d = jnp.float32(delta)
    abs_x = jnp.abs(x)
    quadratic = jnp.minimum(abs_x, d)          # clamp(|x|, max=delta)
    linear = abs_x - quadratic
    return 0.5 * quadratic * quadratic + d * linear


def _huber_kernel(err_ref, out_ref, *, delta: float):
    # Compute in f32 (free on the VPU for this HBM-bound kernel), cast on store.
    x = err_ref[...].astype(jnp.float32)
    out_ref[...] = _huber_math_f32(x, delta).astype(out_ref.dtype)


def _huber_diff_kernel(pred_ref, tgt_ref, out_ref, *, delta: float):
    # Fused error = pred - target: ~40% less HBM traffic than a separate sub.
    x = pred_ref[...].astype(jnp.float32) - tgt_ref[...].astype(jnp.float32)
    out_ref[...] = _huber_math_f32(x, delta).astype(out_ref.dtype)


def _huber_ref(error, delta: float):
    """Plain-JAX reference (also used for tiny inputs and the <128-elem tail)."""
    d = jnp.asarray(delta, dtype=error.dtype)
    abs_e = jnp.abs(error)
    quadratic = jnp.minimum(abs_e, d)
    linear = abs_e - quadratic
    return 0.5 * quadratic * quadratic + d * linear


# ----------------------------- tiling helpers ------------------------------ #

def _choose_tile_rows(rows: int, sublane: int, max_tile_rows: int,
                      min_steps: int = 8) -> int:
    """Pick a row tile: <= max_tile_rows (VMEM), aim for >= min_steps grid
    steps (v7x dual-TC sharding + DMA pipelining), prefer an even step count."""
    max_tile_rows = max(sublane, _round_down(max_tile_rows, sublane))
    target = _round_down(rows // min_steps, sublane)
    tile_rows = max(sublane, min(max_tile_rows, target))
    steps = pl.cdiv(rows, tile_rows)
    if steps > 1 and steps % 2 == 1:
        cand = _round_up(pl.cdiv(rows, steps + 1), sublane)
        if sublane <= cand <= max_tile_rows and pl.cdiv(rows, cand) % 2 == 0:
            tile_rows = cand
    return tile_rows


def _huber_pallas_2d(operands_2d, kernel, out_dtype, tile_rows: int):
    """Run the elementwise Huber kernel over (rows, 128) slabs."""
    rows = operands_2d[0].shape[0]
    grid = (pl.cdiv(rows, tile_rows),)  # ragged last row-block masked by Pallas
    n_elems = rows * _LANE
    itemsize = jnp.dtype(out_dtype).itemsize
    cost = pl.CostEstimate(
        flops=(7 + (len(operands_2d) - 1)) * n_elems,
        transcendentals=0,
        bytes_accessed=(len(operands_2d) + 1) * n_elems * itemsize,
    )
    spec = pl.BlockSpec((tile_rows, _LANE), lambda i: (i, 0))
    return pl.pallas_call(
        kernel,
        out_shape=jax.ShapeDtypeStruct((rows, _LANE), out_dtype),
        grid_spec=pltpu.PrefetchScalarGridSpec(
            num_scalar_prefetch=0,
            grid=grid,
            in_specs=[spec] * len(operands_2d),
            out_specs=spec,
        ),
        compiler_params=pltpu.CompilerParams(
            dimension_semantics=("parallel",),
        ),
        cost_estimate=cost,
    )(*operands_2d)


# ------------------------------ public API ---------------------------------- #

def huber_loss_pallas(
    error: jax.Array,
    delta: float = 1.0,
    *,
    target: jax.Array | None = None,
    max_tile_rows: int = 4096,
    min_pallas_elems: int = 262144,
) -> jax.Array:
    """Elementwise Huber loss (reduction='none'), same shape as the input.

    If `target` is given, `error` is interpreted as `pred` and the subtraction
    `pred - target` is fused into the kernel (saves one full HBM round trip).
    `delta` is a compile-time constant (the module fixes it at construction).
    # TODO(synk): if delta ever needs to vary per-call at runtime, pass it as a
    # scalar-prefetch / SMEM scalar instead of baking it via functools.partial.
    """
    if target is None:
        operands = (error,)
        kernel = functools.partial(_huber_kernel, delta=float(delta))
        out_dtype = error.dtype
        def ref_fn(*ops):
            return _huber_ref(ops[0], delta)
    else:
        assert target.shape == error.shape, "pred/target shape mismatch"
        operands = (error, target)
        kernel = functools.partial(_huber_diff_kernel, delta=float(delta))
        out_dtype = jnp.result_type(error.dtype, target.dtype)
        def ref_fn(*ops):
            return _huber_ref(ops[0].astype(out_dtype) - ops[1].astype(out_dtype), delta)

    orig_shape = error.shape
    n = error.size

    # Tiny tensors: a fused XLA chain is already at the HBM roofline; the
    # pallas_call custom-call overhead only pays off for large slabs.
    if n == 0 or n < min_pallas_elems:
        return ref_fn(*operands)

    flats = tuple(op.reshape(-1) for op in operands)
    n_main = _round_down(n, _LANE)          # 128-lane-aligned prefix (no pad!)
    if n_main == 0:
        return ref_fn(*operands)

    rows = n_main // _LANE
    sublane = _sublane_for_dtype(out_dtype)
    tile_rows = _choose_tile_rows(rows, sublane, max_tile_rows)

    # Contiguous-prefix reshape: zero-copy when n is already lane-aligned.
    mains = tuple(
        (f if n_main == n else f[:n_main]).reshape(rows, _LANE) for f in flats
    )
    out_main = _huber_pallas_2d(mains, kernel, out_dtype, tile_rows)

    out_flat = out_main.reshape(-1)
    if n_main != n:
        # < 128-element tail: cheap XLA epilogue, no full-array pad/slice.
        tails = tuple(f[n_main:] for f in flats)
        out_flat = jnp.concatenate([out_flat, ref_fn(*tails)])
    return out_flat.reshape(orig_shape)


class HuberLoss:
    """JAX/Pallas equivalent of the PyTorch HuberLoss module (reduction='none')."""

    def __init__(self, delta: float = 0.1):
        self._delta = float(delta)

    def __call__(self, error: jax.Array) -> jax.Array:
        return huber_loss_pallas(error, self._delta)


if __name__ == "__main__":
    key = jax.random.PRNGKey(0)
    k1, k2, k3, k4, k5 = jax.random.split(key, 5)

    # 1) Module-style small input (tiny-input XLA fast path).
    x = jax.random.normal(k1, (2, 4, 16, 16), dtype=jnp.float32)
    module = HuberLoss(delta=0.1)
    out = jax.block_until_ready(module(x))
    assert out.shape == x.shape and out.dtype == x.dtype
    assert jnp.allclose(out, _huber_ref(x, 0.1), atol=1e-6, rtol=1e-6), "small-path mismatch"

    # 2) Ragged element count -> Pallas over the lane-aligned prefix (no pad),
    #    XLA tail epilogue, multi-step (even) grid with a ragged last row block.
    y = jax.random.normal(k2, (2, 3, 129, 130), dtype=jnp.float32)
    out_y = jax.block_until_ready(
        huber_loss_pallas(y, delta=1.0, min_pallas_elems=1)
    )
    assert out_y.shape == y.shape and out_y.dtype == y.dtype
    assert jnp.allclose(out_y, _huber_ref(y, 1.0), atol=1e-6, rtol=1e-6), "ragged-path mismatch"

    # 3) Aligned element count -> fully zero-copy Pallas path (8 grid steps).
    z = jax.random.normal(k3, (64, 32, 32), dtype=jnp.float32)
    out_z = jax.block_until_ready(huber_loss_pallas(z, delta=0.1, min_pallas_elems=1))
    assert out_z.shape == z.shape and out_z.dtype == z.dtype
    assert jnp.allclose(out_z, _huber_ref(z, 0.1), atol=1e-6, rtol=1e-6), "aligned-path mismatch"

    # 4) Fused (pred, target) path: subtraction happens inside the kernel.
    pred = jax.random.normal(k4, (2, 3, 129, 130), dtype=jnp.float32)
    tgt = jax.random.normal(k5, (2, 3, 129, 130), dtype=jnp.float32)
    out_f = jax.block_until_ready(
        huber_loss_pallas(pred, delta=0.1, target=tgt, min_pallas_elems=1)
    )
    assert out_f.shape == pred.shape and out_f.dtype == pred.dtype
    assert jnp.allclose(out_f, _huber_ref(pred - tgt, 0.1), atol=1e-6, rtol=1e-6), "fused-path mismatch"

    print("KERNEL_OK")
</pallas_src>

<mosaic_0001>
module attributes {stable_mosaic.version = 11 : i64} {
  func.func @_huber_kernel(%arg0: i32, %arg1: memref<80x128xf32, #tpu.memory_space<vmem>>, %arg2: memref<80x128xf32, #tpu.memory_space<vmem>>) attributes {dimension_semantics = [#tpu.dimension_semantics<parallel>], iteration_bounds = array<i64: 10>, scalar_prefetch = 0 : i64, scratch_operands = 0 : i64, tpu.core_type = #tpu.core_type<tc>, window_params = [{transform_indices = @transform_0, window_bounds = array<i64: 80, 128>}, {transform_indices = @transform_1, window_bounds = array<i64: 80, 128>}]} {
    %c0 = arith.constant 0 : index
    %c0_0 = arith.constant 0 : index
    %0 = vector.load %arg1[%c0, %c0_0] : memref<80x128xf32, #tpu.memory_space<vmem>>, vector<80x128xf32>
    %1 = math.absf %0 : vector<80x128xf32>
    %cst = arith.constant 1.000000e+00 : f32
    %2 = vector.broadcast %cst : f32 to vector<80x128xf32>
    %3 = arith.minimumf %1, %2 : vector<80x128xf32>
    %4 = arith.subf %1, %3 : vector<80x128xf32>
    %cst_1 = arith.constant 5.000000e-01 : f32
    %5 = vector.broadcast %cst_1 : f32 to vector<80x128xf32>
    %6 = arith.mulf %5, %3 : vector<80x128xf32>
    %7 = arith.mulf %6, %3 : vector<80x128xf32>
    %cst_2 = arith.constant 1.000000e+00 : f32
    %8 = vector.broadcast %cst_2 : f32 to vector<80x128xf32>
    %9 = arith.mulf %8, %4 : vector<80x128xf32>
    %10 = arith.addf %7, %9 : vector<80x128xf32>
    %c0_3 = arith.constant 0 : index
    %c0_4 = arith.constant 0 : index
    %11 = vector.load %arg2[%c0_3, %c0_4] : memref<80x128xf32, #tpu.memory_space<vmem>>, vector<80x128xf32>
    tpu.vector_store %arg2[%c0_3, %c0_4], %10 {strides = array<i32>} : memref<80x128xf32, #tpu.memory_space<vmem>>, vector<80x128xf32>,
    return
  }
  func.func @transform_0(%arg0: i32) -> (i32, i32) {
    %c0_i32 = arith.constant 0 : i32
    %c0_i32_0 = arith.constant 0 : i32
    return %arg0, %c0_i32 : i32, i32
  }
  func.func @transform_1(%arg0: i32) -> (i32, i32) {
    %c0_i32 = arith.constant 0 : i32
    %c0_i32_0 = arith.constant 0 : i32
    return %arg0, %c0_i32 : i32, i32
  }
}

</mosaic_0001>

<bundles_post_ra>
// kernel: tpu_custom_call.1
= control target key start
LH: loop header
LB: loop body
LE: loop exit
PB: predicated region body
PF: predicated region fallthrough
CT: control target
= control target key end

     0   :  { %6 = vsyncpa [#allocation3], 0  ;;  %s695_s0 = inlined_call_operand.hbm [shape: f32[786,128], index: 0, kind: input, shape index: {}]   ;;  %s696_s1 = inlined_call_operand.hbm [shape: f32[786,128], index: 1, kind: output, shape index: {}]  }
   0x1   :  { %8 = vsyncpa [#allocation3 + $0x1], 0 }
   0x2   :  { %9 = vsyncpa [#allocation4], 0 }
   0x3   :  { %11 = vsyncpa [#allocation4 + $0x1], 0  ;;  %s499_s6 = smov 0   ;;  %s501_s7 = smov 0  }
   0x4   :  { %s503_s8 = smov 0   ;;  %s505_s9 = smov 0  }
   0x5 LB: > { %s520_s10 = sadd.s32 4294967295, %s481_s9   ;;  %s324_s11 = sadd.s32 4294967294, %s481_s9   ;;  %s481_s9 = sphi %s505_s9, %s704_s9   ;;  %s477_s8 = sphi %s503_s8, %s703_s8   ;;  %s473_s7 = sphi %s501_s7, %s702_s7   ;;  %s469_s6 = sphi %s499_s6, %s701_s6  }
   0x6   : > { %s524_s12 = sadd.s32 1, %s481_s9   ;;  %s24_s13 = sadd.s32 1, %s477_s8 }
   0x7   : > { %s21_s14 = ssub.s32 %s481_s9, %s524_s12  ;;  %p31_p0 = scmp.ne.s32.totalorder %s477_s8, %s473_s7 }
   0x8   : > { %p22_p1 = scmp.eq.s32.totalorder %s21_s14, 0  ;;  %p32_p2 = scmp.eq.s32.totalorder %s481_s9, 0 }
   0x9   : > { %p37_p3 = scmp.ne.s32.totalorder %s473_s7, %s469_s6  ;;  %p38_p4 = scmp.eq.s32.totalorder %s520_s10, 0 }
   0xa   : > { %s536_s15 = scalar_select %p22_p1, %s477_s8, %s24_s13  }
   0xb   : > { %p33_p5 = por %p32_p2, %p31_p0  ;;  %p538_p6 = por %p38_p4, %p37_p3 }
   0xc   : > { %p61_p7 = scmp.eq.s32.totalorder %s520_s10, 9  ;;  %p67_p8 = scmp.eq.s32.totalorder %s324_s11, 9 }
   0xd   : > { %p326_p11 = scmp.ge.s32.totalorder %s481_s9, 10 }
   0xe   : > { %p543_p9 = por %p61_p7, %p31_p0  ;;  %p547_p10 = por %p67_p8, %p37_p3 }
   0xf   : > { %83 = sbr.rel (%p326_p11) target bundleno = 57 (0x39), region = 16 }
  0x10   : > { %s699_s18 = scalar_select %p547_p10, 1, 0 }
  0x16   : > { %86 = sbr.rel (!%p33_p5) target bundleno = 57 (0x39), region = 20  ;;  %s87_s19 = sand.u32 (%p33_p5), 1, %s477_s8  }
  0x17   : > { %s92_s20 = smul.u32 (%p33_p5), 10, %s481_s9  ;;  %s557_s25 = scalar_lea.sflag (%p33_p5), [#allocation3], %s87_s19 }
  0x18   : > { %s342_s21 = smul.u32 (%p33_p5), 80, %s87_s19 }
  0x19   : > { %s93_s22 = ssub.s32 (%p33_p5), 99, %s92_s20 }
  0x1a   : > { %p94_p12 = scmp.lt.s32.totalorder (%p33_p5), %s93_s22, 10  ;;  %s91_s26 = scalar_lea.vmem (%p33_p5), [#allocation2], %s342_s21 }
  0x1d   : > { %s706_s22 = smov (!%p94_p12, %s93_s22), 10 }
  0x1e   : > { %s554_s23 = sshll.u32 %s706_s22, 7 }
  0x1f   : > { %s98_s24 = ssub.s32 1280, %s554_s23 }
  0x20   : > { %99 = vsyncadd %s557_s25, %s98_s24  ;;  %p328_p13 = scmp.ne.s32.totalorder %s554_s23, 0  ;;  %s340_s27 = smul.u32 1280, %s481_s9 }
  0x21   : > { %s104_s28 = sshll.u32 %s91_s26, 4  ;;  %s391_s11 = scalar_lea.hbm %s695_s0, 12672  ;;  %s567_s28 = int_to_ptr.vmem [resolvable:$true] %s104_s28 }
  0x22   : > { %s565_s2 = scalar_lea.hbm %s695_s0, %s340_s27 }
  0x23   : > { %s387_s3 = scalar_lea.hbm %s565_s2, %s554_s23  ;;  %p392_p3 = scmp.lt.u32.totalorder %s565_s2, %s695_s0 }
  0x24   : > { %p388_p0 = scmp.ne.s32.totalorder %s565_s2, %s387_s3  ;;  %p393_p4 = scmp.lt.u32.totalorder %s391_s11, %s387_s3 }
  0x25   : > { %p395_p7 = scmp.lt.u32.totalorder %s387_s3, %s565_s2 }
  0x26   : > { %p389_p1 = pnand %p388_p0, %p328_p13  ;;  %p394_p5 = por %p393_p4, %p392_p3 }
  0x28   : > { %p390_p2 = pneg %p389_p1  ;;  %p396_p8 = por %p395_p7, %p394_p5 }
  0x2a   : > { %p397_p11 = pnand %p396_p8, %p390_p2 }
  0x2c   : > { %400 = shalt.err (!%p397_p11)
}
  0x2d   : > { %s401_s19 = scalar_lea.vmem %s567_s28, %s554_s23  ;;  %s483_s20 = smov [#allocation2]  }
  0x2e   : > { %p402_p12 = scmp.ne.s32.totalorder %s567_s28, %s401_s19  ;;  %s405_s21 = sshll.u32 %s483_s20, 4  ;;  %s406_s21 = int_to_ptr.vmem [resolvable:$false] %s405_s21 }
  0x2f   : > { %s407_s22 = scalar_lea.vmem %s406_s21, 2560  ;;  %p408_p10 = scmp.lt.s32.totalorder %s567_s28, %s406_s21 }
  0x30   : > { %p403_p0 = pnand %p402_p12, %p328_p13  ;;  %p409_p3 = scmp.lt.s32.totalorder %s407_s22, %s401_s19 }
  0x32   : > { %p404_p1 = pneg %p403_p0  ;;  %p410_p4 = por %p409_p3, %p408_p10 }
  0x34   : > { %p411_p5 = pnand %p410_p4, %p404_p1 }
  0x36   : > { %414 = shalt.err (!%p411_p5)
}
  0x37   : > { %s484_s24 = smov 128   ;;  %s485_s26 = smov 8  }
  0x38   : > { %110 = dma.hbm_to_vmem [thread:$0]  (%p328_p13), %s565_s2, %s554_s23, %s567_s28, %s557_s25, %s484_s24, %s484_s24, %s485_s26  }
  0x39 PF: > { %p332_p2 = scmp.ge.s32.totalorder %s481_s9, 1  ;;  %p112_p7 = scmp.lt.s32.totalorder %s481_s9, 11 }
  0x3b   : > { %p113_p8 = pnand %p332_p2, %p112_p7 }
  0x3c   : > { %s597_s27 = sand.u32 (!%p113_p8), 1, %s473_s7  }
  0x3d   : > { %116 = sbr.rel (%p113_p8) target bundleno = 120 (0x78), region = 24  ;;  %s119_s30 = scalar_lea.sflag (!%p113_p8), [#allocation3], %s597_s27 }
  0x3e   : > { %s343_s29 = smul.u32 (!%p113_p8), 80, %s597_s27 }
  0x40   : > { %s603_s3 = scalar_lea.vmem (!%p113_p8), [#allocation2], %s343_s29 }
  0x44   : > { %460 = dma.done.wait (%p538_p6), %s119_s30, 1280  }
  0x45   : > { %462 = vsyncadd (%p538_p6), %s119_s30, 4294966016  ;;  %v151_v0 = vld [vmem:[%s603_s3] sm:$0xff]  ;;  %v152_v1 = vld [vmem:[%s603_s3 + $0x8] sm:$0xff]  ;;  %s621_s16 = scalar_lea.vmem [#allocation5], %s343_s29  ;;  %s232_s23 = scalar_lea.sflag [#allocation4], %s597_s27 }
  0x46   : > { %v153_v2 = vld [vmem:[%s603_s3 + $0x10] sm:$0xff]  ;;  %v161_v3 = vand.u32 2147483647, %v151_v0  ;;  %v162_v4 = vand.u32 2147483647, %v152_v1  ;;  %v154_v6 = vld [vmem:[%s603_s3 + $0x18] sm:$0xff] }
  0x47   : > { %v163_v5 = vand.u32 2147483647, %v153_v2  ;;  %v155_v7 = vld [vmem:[%s603_s3 + $0x20] sm:$0xff]  ;;  %v156_v8 = vld [vmem:[%s603_s3 + $0x28] sm:$0xff]  ;;  %v164_v12 = vand.u32 2147483647, %v154_v6 }
  0x48   : > { %v171_v9 = vmin.f32 %v161_v3, 1.0  ;;  %v172_v10 = vmin.f32 %v162_v4, 1.0  ;;  %v157_v13 = vld [vmem:[%s603_s3 + $0x30] sm:$0xff]  ;;  %v165_v14 = vand.u32 2147483647, %v155_v7  ;;  %v158_v33 = vld [vmem:[%s603_s3 + $0x38] sm:$0xff] }
  0x49   : > { %v173_v11 = vmin.f32 %v163_v5, 1.0  ;;  %v166_v15 = vand.u32 2147483647, %v156_v8  ;;  %v167_v16 = vand.u32 2147483647, %v157_v13  ;;  %v174_v23 = vmin.f32 %v164_v12, 1.0 }
  0x4a   : > { %v181_v17 = vsub.f32 %v161_v3, %v171_v9  ;;  %v191_v18 = vmul.f32 0.5, %v171_v9  ;;  %v182_v19 = vsub.f32 %v162_v4, %v172_v10  ;;  %v192_v20 = vmul.f32 0.5, %v172_v10  ;;  %v159_v34 = vld [vmem:[%s603_s3 + $0x40] sm:$0xff]  ;;  %v160_v39 = vld [vmem:[%s603_s3 + $0x48] sm:$0xff]  ;;  %s239_s25 = smul.u32 (%p543_p9), 10, %s520_s10 }
  0x4b   : > { %v183_v21 = vsub.f32 %v163_v5, %v173_v11  ;;  %v193_v22 = vmul.f32 0.5, %v173_v11  ;;  %v175_v24 = vmin.f32 %v165_v14, 1.0  ;;  %v176_v27 = vmin.f32 %v166_v15, 1.0 }
  0x4c   : > { %v201_v25 = vmul.f32 %v191_v18, %v171_v9  ;;  %v202_v26 = vmul.f32 %v192_v20, %v172_v10  ;;  %v177_v28 = vmin.f32 %v167_v16, 1.0  ;;  %v184_v30 = vsub.f32 %v164_v12, %v174_v23  ;;  %s240_s28 = ssub.s32 (%p543_p9), 99, %s239_s25 }
  0x4d   : > { %v203_v29 = vmul.f32 %v193_v22, %v173_v11  ;;  %v194_v31 = vmul.f32 0.5, %v174_v23  ;;  %v185_v32 = vsub.f32 %v165_v14, %v175_v24  ;;  %v195_v37 = vmul.f32 0.5, %v175_v24  ;;  %p241_p6 = scmp.lt.s32.totalorder (%p543_p9), %s240_s28, 10 }
  0x4e   : > { %v211_v35 = vadd.f32 %v201_v25, %v181_v17  ;;  %v212_v36 = vadd.f32 %v202_v26, %v182_v19  ;;  %v186_v38 = vsub.f32 %v166_v15, %v176_v27  ;;  %v196_v42 = vmul.f32 0.5, %v176_v27 }
  0x4f   : > { %v213_v40 = vadd.f32 %v203_v29, %v183_v21  ;;  %v204_v41 = vmul.f32 %v194_v31, %v174_v23  ;;  %v187_v43 = vsub.f32 %v167_v16, %v177_v28  ;;  %v205_v44 = vmul.f32 %v195_v37, %v175_v24 }
  0x50   : > { %221 = vst [vmem:[%s621_s16] sm:$0xff] %v211_v35  ;;  %222 = vst [vmem:[%s621_s16 + $0x8] sm:$0xff] %v212_v36  ;;  %v197_v45 = vmul.f32 0.5, %v177_v28  ;;  %v168_v46 = vand.u32 2147483647, %v158_v33  ;;  %v169_v47 = vand.u32 2147483647, %v159_v34  ;;  %v206_v49 = vmul.f32 %v196_v42, %v176_v27 }
  0x51   : > { %223 = vst [vmem:[%s621_s16 + $0x10] sm:$0xff] %v213_v40  ;;  %v214_v48 = vadd.f32 %v204_v41, %v184_v30  ;;  %v170_v50 = vand.u32 2147483647, %v160_v39  ;;  %v215_v51 = vadd.f32 %v205_v44, %v185_v32 }
  0x52   : > { %v207_v52 = vmul.f32 %v197_v45, %v177_v28  ;;  %v178_v53 = vmin.f32 %v168_v46, 1.0  ;;  %v179_v54 = vmin.f32 %v169_v47, 1.0  ;;  %v216_v55 = vadd.f32 %v206_v49, %v186_v38 }
  0x53   : > { %224 = vst [vmem:[%s621_s16 + $0x18] sm:$0xff] %v214_v48  ;;  %v180_v56 = vmin.f32 %v170_v50, 1.0  ;;  %225 = vst [vmem:[%s621_s16 + $0x20] sm:$0xff] %v215_v51 }
  0x54   : > { %v217_v57 = vadd.f32 %v207_v52, %v187_v43  ;;  %v188_v58 = vsub.f32 %v168_v46, %v178_v53  ;;  %v198_v59 = vmul.f32 0.5, %v178_v53  ;;  %226 = vst [vmem:[%s621_s16 + $0x28] sm:$0xff] %v216_v55  ;;  %v189_v60 = vsub.f32 %v169_v47, %v179_v54 }
  0x55   : > { %v199_v61 = vmul.f32 0.5, %v179_v54  ;;  %v190_v62 = vsub.f32 %v170_v50, %v180_v56  ;;  %v200_v63 = vmul.f32 0.5, %v180_v56  ;;  %238 = sbr.rel (!%p543_p9) target bundleno = 120 (0x78), region = 32 }
  0x56   : > { %227 = vst [vmem:[%s621_s16 + $0x30] sm:$0xff] %v217_v57  ;;  %v208_v0 = vmul.f32 %v198_v59, %v178_v53 }
  0x57   : > { %v209_v1 = vmul.f32 %v199_v61, %v179_v54  ;;  %v210_v2 = vmul.f32 %v200_v63, %v180_v56 }
  0x58   : > { %v218_v3 = vadd.f32 %v208_v0, %v188_v58 }
  0x59   : > { %v219_v4 = vadd.f32 %v209_v1, %v189_v60  ;;  %v220_v5 = vadd.f32 %v210_v2, %v190_v62 }
  0x5a   : > { %228 = vst [vmem:[%s621_s16 + $0x38] sm:$0xff] %v218_v3 }
  0x5b   : > { %229 = vst [vmem:[%s621_s16 + $0x40] sm:$0xff] %v219_v4  ;;  %230 = vst [vmem:[%s621_s16 + $0x48] sm:$0xff] %v220_v5 }
  0x5c   : > { %s708_s28 = smov (!%p241_p6, %s240_s28), 10 }
  0x5d   : > { %s637_s2 = sshll.u32 %s708_s28, 7 }
  0x5e   : > { %s245_s4 = ssub.s32 1280, %s637_s2 }
  0x5f   : > { %246 = vsyncadd %s232_s23, %s245_s4  ;;  %p334_p10 = scmp.ne.s32.totalorder %s637_s2, 0  ;;  %s341_s17 = smul.u32 1280, %s520_s10 }
  0x60   : > { %s251_s5 = sshll.u32 %s621_s16, 4  ;;  %s486_s20 = smov [#allocation5]   ;;  %s650_s5 = int_to_ptr.vmem [resolvable:$true] %s251_s5 }
  0x61   : > { %s648_s14 = scalar_lea.hbm %s696_s1, %s341_s17  ;;  %s415_s19 = scalar_lea.vmem %s650_s5, %s637_s2 }
  0x62   : > { %p416_p9 = scmp.ne.s32.totalorder %s650_s5, %s415_s19  ;;  %s419_s21 = sshll.u32 %s486_s20, 4  ;;  %s420_s21 = int_to_ptr.vmem [resolvable:$false] %s419_s21 }
  0x63   : > { %s421_s10 = scalar_lea.vmem %s420_s21, 2560  ;;  %p422_p12 = scmp.lt.s32.totalorder %s650_s5, %s420_s21 }
  0x64   : > { %p417_p13 = pnand %p416_p9, %p334_p10  ;;  %p423_p0 = scmp.lt.s32.totalorder %s421_s10, %s415_s19 }
  0x66   : > { %p418_p11 = pneg %p417_p13  ;;  %p424_p1 = por %p423_p0, %p422_p12 }
  0x68   : > { %p425_p3 = pnand %p424_p1, %p418_p11 }
  0x6a   : > { %428 = shalt.err (!%p425_p3)
}
  0x6b   : > { %s429_s22 = scalar_lea.hbm %s648_s14, %s637_s2  ;;  %s433_s29 = scalar_lea.hbm %s696_s1, 12672 }
  0x6c   : > { %p430_p4 = scmp.ne.s32.totalorder %s648_s14, %s429_s22  ;;  %p434_p7 = scmp.lt.u32.totalorder %s648_s14, %s696_s1 }
  0x6d   : > { %p435_p8 = scmp.lt.u32.totalorder %s433_s29, %s429_s22  ;;  %p437_p9 = scmp.lt.u32.totalorder %s429_s22, %s648_s14 }
  0x6e   : > { %p431_p5 = pnand %p430_p4, %p334_p10 }
  0x6f   : > { %p436_p6 = por %p435_p8, %p434_p7 }
  0x70   : > { %p432_p2 = pneg %p431_p5 }
  0x71   : > { %p438_p13 = por %p437_p9, %p436_p6 }
  0x73   : > { %p439_p11 = pnand %p438_p13, %p432_p2 }
  0x75   : > { %442 = shalt.err (!%p439_p11)
}
  0x76   : > { %s487_s16 = smov 128   ;;  %s488_s25 = smov 8  }
  0x77   : > { %257 = dma.vmem_to_hbm [thread:$0]  (%p334_p10), %s650_s5, %s637_s2, %s648_s14, %s232_s23, %s487_s16, %s487_s16, %s488_s25  }
  0x78 PF: > { %p350_p12 = scmp.ge.s32.totalorder %s481_s9, 2  ;;  %s266_s28 = sand.u32 1, %s469_s6  }
  0x79   : > { %p700_p0 = scmp.ne.s32.totalorder %s699_s18, 0  ;;  %s267_s4 = scalar_lea.sflag [#allocation4], %s266_s28 }
  0x7b   : > { %p347_p1 = pnand %p350_p12, %p700_p0 }
  0x7d   : > { %464 = dma.done.wait (!%p347_p1), %s267_s4, 1280  }
  0x7e   : > { %466 = vsyncadd (!%p347_p1), %s267_s4, 4294966016  ;;  %p14_p3 = scmp.ge.s32.totalorder %s524_s12, 12   ;;  %s701_s6 = smov %s473_s7 }
  0x7f   : > { %s702_s7 = smov %s477_s8  ;;  %s703_s8 = smov %s536_s15 }
  0x80   : > { %s704_s9 = smov %s524_s12  ;;  %16 = sbr.rel (!%p14_p3) target bundleno = 5 (0x5), region = 69 }
  0x87   :  { %272 = vsyncpa [#allocation3], 1 }
  0x88   :  { %274 = vsyncpa [#allocation3 + $0x1], 1 }
  0x89   :  { %275 = vsyncpa [#allocation4], 1 }
  0x8a   :  { %277 = vsyncpa [#allocation4 + $0x1], 1 }

</bundles_post_ra>
